<compile_context>
chip_gen: v6e
topology: v6e:2x2x1
jax: 0.10.0
libtpu: 0.0.40
codegen_flags: <defaults>
</compile_context>

<pallas_src>
import functools
import math

import jax
import jax.numpy as jnp
from jax.experimental import pallas as pl
from jax.experimental.pallas import tpu as pltpu


def _head_attention_kernel(*refs, dp, causal):
    if causal:
        x_ref, wqkv_ref, bqkv_ref, mask_ref, o_ref = refs
    else:
        x_ref, wqkv_ref, bqkv_ref, o_ref = refs
        mask_ref = None

    TB, S, H = x_ref.shape

    # One wide fused projection on the MXU: (TB*S, H) @ (H, 3*Dp), f32 accumulate.
    x2 = x_ref[...].reshape(TB * S, H)
    qkv = jnp.dot(x2, wqkv_ref[...], preferred_element_type=jnp.float32)
    qkv = qkv + bqkv_ref[...]                       # single bias broadcast (f32)

    q = qkv[:, 0 * dp:1 * dp].reshape(TB, S, dp)    # 1/sqrt(D) already folded in
    k = qkv[:, 1 * dp:2 * dp].reshape(TB, S, dp)
    v = qkv[:, 2 * dp:3 * dp].reshape(TB, S, dp)

    # Scores without materializing K^T: contract the last axis of both operands.
    s = jnp.einsum("bqd,bkd->bqk", q, k, preferred_element_type=jnp.float32)

    if causal:
        s = s + mask_ref[...]                       # resident additive mask (S, S)

    # Numerically-stable softmax with deferred normalization.
    m = jnp.max(s, axis=-1, keepdims=True)
    p = jnp.exp(s - m)
    l = jnp.sum(p, axis=-1, keepdims=True)

    out = jnp.einsum("bqk,bkd->bqd", p, v, preferred_element_type=jnp.float32)
    out = out * pl.reciprocal(l)                    # exact; (TB,S,1) scale, not (S,S) div
    o_ref[...] = out.astype(o_ref.dtype)


def _pick_block_b(B, max_tb=8, min_steps=2):
    """Largest per-step batch tile dividing B while keeping >= min_steps grid steps
    (so the 'parallel' axis still feeds both v7x TensorCores)."""
    best = 1
    for tb in range(1, min(B, max_tb) + 1):
        if B % tb == 0 and B // tb >= min_steps:
            best = tb
    return best


def head_attention(x, wq, bq, wk, bk, wv, bv, *, mask=True, compute_dtype=None):
    """x: (B, S, H). w*: (H, D) pre-transposed to (in, out). b*: (D,).
    Returns (B, S, D). Set compute_dtype=jnp.bfloat16 on v6e/v7x for bf16 MXU
    inputs (softmax math stays f32)."""
    B, S, H = x.shape
    D = wq.shape[1]
    out_dtype = x.dtype
    scale = 1.0 / math.sqrt(D)

    # Lane-dense head dim: pad D to a multiple of 128 with zero columns so output
    # stores are unmasked; the zero columns contribute nothing to q.k or p@v.
    Dp = 128 * pl.cdiv(D, 128)

    # Fused, padded QKV weight/bias; 1/sqrt(D) folded into the Q columns.
    wqkv = jnp.zeros((H, 3 * Dp), x.dtype)
    wqkv = wqkv.at[:, 0:D].set(wq * scale)
    wqkv = wqkv.at[:, Dp:Dp + D].set(wk)
    wqkv = wqkv.at[:, 2 * Dp:2 * Dp + D].set(wv)
    bqkv = jnp.zeros((1, 3 * Dp), jnp.float32)
    bqkv = bqkv.at[0, 0:D].set((bq * scale).astype(jnp.float32))
    bqkv = bqkv.at[0, Dp:Dp + D].set(bk.astype(jnp.float32))
    bqkv = bqkv.at[0, 2 * Dp:2 * Dp + D].set(bv.astype(jnp.float32))

    if compute_dtype is not None:                   # bf16 MXU operands (v6e/v7x)
        x = x.astype(compute_dtype)
        wqkv = wqkv.astype(compute_dtype)

    TB = _pick_block_b(B)
    grid = (B // TB,)

    kernel = functools.partial(_head_attention_kernel, dp=Dp, causal=mask)

    in_specs = [
        pl.BlockSpec((TB, S, H), lambda b: (b, 0, 0)),     # TB batch rows per step
        pl.BlockSpec((H, 3 * Dp), lambda b: (0, 0)),       # resident fused weight
        pl.BlockSpec((1, 3 * Dp), lambda b: (0, 0)),       # resident fused bias
    ]
    args = [x, wqkv, bqkv]
    if mask:
        row = jnp.arange(S)[:, None]
        col = jnp.arange(S)[None, :]
        # Built once here, resident in VMEM; large finite negative instead of -inf.
        add_mask = jnp.where(col <= row, 0.0, -1e30).astype(jnp.float32)
        in_specs.append(pl.BlockSpec((S, S), lambda b: (0, 0)))
        args.append(add_mask)

    itemsize = jnp.dtype(x.dtype).itemsize
    cost = pl.CostEstimate(
        flops=2 * B * S * H * 3 * Dp + 2 * 2 * B * S * S * Dp,
        transcendentals=B * S * S,
        bytes_accessed=(x.size * itemsize + wqkv.size * itemsize + bqkv.size * 4
                        + B * S * Dp * jnp.dtype(out_dtype).itemsize),
    )

    # Rough VMEM budget (double-buffered blocks + f32 intermediates). Only raise
    # the scoped limit when the default would be tight; cap well inside v7x 64 MiB.
    vmem_est = (2 * TB * S * H * itemsize
                + 2 * TB * S * Dp * jnp.dtype(out_dtype).itemsize
                + 2 * (H * 3 * Dp) * itemsize + 2 * 3 * Dp * 4 + 2 * S * S * 4
                + 4 * (TB * S * 3 * Dp + 2 * TB * S * S + 2 * TB * S * Dp))
    vmem_limit = int(min(64 << 20, vmem_est * 3 // 2)) if vmem_est > (16 << 20) else None

    out = pl.pallas_call(
        kernel,
        out_shape=jax.ShapeDtypeStruct((B, S, Dp), out_dtype),
        grid=grid,
        in_specs=in_specs,
        out_specs=pl.BlockSpec((TB, S, Dp), lambda b: (b, 0, 0)),
        compiler_params=pltpu.CompilerParams(
            dimension_semantics=("parallel",),
            vmem_limit_bytes=vmem_limit),
        cost_estimate=cost,
    )(*args)

    return out[..., :D] if Dp != D else out


def init_params(key, num_hidden, dim_head):
    """torch.nn.Linear-style init: U(-1/sqrt(in), 1/sqrt(in)); weights stored
    pre-transposed to (in, out) for row-major MXU matmuls."""
    ks = jax.random.split(key, 6)
    bound = 1.0 / math.sqrt(num_hidden)
    u = lambda k, shape: jax.random.uniform(k, shape, jnp.float32, -bound, bound)
    return (u(ks[0], (num_hidden, dim_head)), u(ks[1], (dim_head,)),
            u(ks[2], (num_hidden, dim_head)), u(ks[3], (dim_head,)),
            u(ks[4], (num_hidden, dim_head)), u(ks[5], (dim_head,)))


def _reference(x, wq, bq, wk, bk, wv, bv, mask):
    q = x @ wq + bq
    k = x @ wk + bk
    v = x @ wv + bv
    D = q.shape[-1]
    s = jnp.einsum("bqd,bkd->bqk", q, k) / jnp.sqrt(jnp.float32(D))
    if mask:
        S = s.shape[-1]
        causal = jnp.tril(jnp.ones((S, S), jnp.float32))[None, :, :]
        s = jnp.where(causal == 0, -jnp.inf, s)
    p = jax.nn.softmax(s, axis=-1)
    return jnp.einsum("bqk,bkd->bqd", p, v)


if __name__ == "__main__":
    batch, seq, num_hidden, dim_head = 2, 8, 32, 16
    key = jax.random.PRNGKey(0)
    kx, kp = jax.random.split(key)

    x = jax.random.normal(kx, (batch, seq, num_hidden), jnp.float32)
    wq, bq, wk, bk, wv, bv = init_params(kp, num_hidden, dim_head)

    for use_mask in (True, False):
        out = head_attention(x, wq, bq, wk, bk, wv, bv, mask=use_mask)
        out = jax.block_until_ready(out)
        ref = _reference(x, wq, bq, wk, bk, wv, bv, use_mask)
        assert out.shape == (batch, seq, dim_head)
        assert jnp.allclose(out, ref, atol=1e-4, rtol=1e-4), (
            f"mismatch vs reference (mask={use_mask})")

    print("KERNEL_OK")
</pallas_src>

<mosaic_0001>
module attributes {stable_mosaic.version = 11 : i64} {
  func.func @_head_attention_kernel(%arg0: i32, %arg1: memref<1x8x32xf32, #tpu.memory_space<vmem>>, %arg2: memref<32x384xf32, #tpu.memory_space<vmem>>, %arg3: memref<1x384xf32, #tpu.memory_space<vmem>>, %arg4: memref<8x8xf32, #tpu.memory_space<vmem>>, %arg5: memref<1x8x128xf32, #tpu.memory_space<vmem>>) attributes {dimension_semantics = [#tpu.dimension_semantics<parallel>], iteration_bounds = array<i64: 2>, scalar_prefetch = 0 : i64, scratch_operands = 0 : i64, tpu.core_type = #tpu.core_type<tc>, window_params = [{transform_indices = @transform_0, window_bounds = array<i64: 1, 8, 32>}, {pipeline_mode = #tpu.pipeline_mode<synchronous>, transform_indices = @transform_1, window_bounds = array<i64: 32, 384>}, {pipeline_mode = #tpu.pipeline_mode<synchronous>, transform_indices = @transform_2, window_bounds = array<i64: 1, 384>}, {pipeline_mode = #tpu.pipeline_mode<synchronous>, transform_indices = @transform_3, window_bounds = array<i64: 8, 8>}, {transform_indices = @transform_4, window_bounds = array<i64: 1, 8, 128>}]} {
    %c0 = arith.constant 0 : index
    %c0_0 = arith.constant 0 : index
    %c0_1 = arith.constant 0 : index
    %0 = vector.load %arg1[%c0, %c0_0, %c0_1] : memref<1x8x32xf32, #tpu.memory_space<vmem>>, vector<1x8x32xf32>
    %1 = vector.shape_cast %0 : vector<1x8x32xf32> to vector<8x32xf32>
    %c0_2 = arith.constant 0 : index
    %c0_3 = arith.constant 0 : index
    %2 = vector.load %arg2[%c0_2, %c0_3] : memref<32x384xf32, #tpu.memory_space<vmem>>, vector<32x384xf32>
    %cst = arith.constant dense<0.000000e+00> : vector<8x384xf32>
    %3 = tpu.matmul %1, %2, %cst {dimension_numbers = #tpu.dot_dimension_numbers<[1], [0], [0], [1], [0, 0, 1, 1], [], []>} : vector<8x32xf32>, vector<32x384xf32>, vector<8x384xf32> -> vector<8x384xf32>
    %c0_4 = arith.constant 0 : index
    %c0_5 = arith.constant 0 : index
    %4 = vector.load %arg3[%c0_4, %c0_5] : memref<1x384xf32, #tpu.memory_space<vmem>>, vector<1x384xf32>
    %5 = vector.broadcast %4 : vector<1x384xf32> to vector<8x384xf32>
    %6 = arith.addf %3, %5 : vector<8x384xf32>
    %7 = vector.extract_strided_slice %6 {offsets = [0, 0], sizes = [8, 128], strides = [1, 1]} : vector<8x384xf32> to vector<8x128xf32>
    %8 = vector.shape_cast %7 : vector<8x128xf32> to vector<1x8x128xf32>
    %9 = vector.extract_strided_slice %6 {offsets = [0, 128], sizes = [8, 128], strides = [1, 1]} : vector<8x384xf32> to vector<8x128xf32>
    %10 = vector.shape_cast %9 : vector<8x128xf32> to vector<1x8x128xf32>
    %11 = vector.extract_strided_slice %6 {offsets = [0, 256], sizes = [8, 128], strides = [1, 1]} : vector<8x384xf32> to vector<8x128xf32>
    %12 = vector.shape_cast %11 : vector<8x128xf32> to vector<1x8x128xf32>
    "tpu.trace_start"() <{level = 10 : i32, message = "bqd,bkd->bqk"}> : () -> ()
    %cst_6 = arith.constant dense<0.000000e+00> : vector<1x8x8xf32>
    %13 = tpu.matmul %8, %10, %cst_6 {dimension_numbers = #tpu.dot_dimension_numbers<[2], [2], [1], [1], [0, 0, 0, 1, 1, 1], [0], [0]>} : vector<1x8x128xf32>, vector<1x8x128xf32>, vector<1x8x8xf32> -> vector<1x8x8xf32>
    "tpu.trace_stop"() : () -> ()
    %c0_7 = arith.constant 0 : index
    %c0_8 = arith.constant 0 : index
    %14 = vector.load %arg4[%c0_7, %c0_8] : memref<8x8xf32, #tpu.memory_space<vmem>>, vector<8x8xf32>
    %15 = vector.shape_cast %14 : vector<8x8xf32> to vector<1x8x8xf32>
    %16 = arith.addf %13, %15 : vector<1x8x8xf32>
    %cst_9 = arith.constant dense<0xFF800000> : vector<1x8xf32>
    %17 = vector.multi_reduction <maximumf>, %16, %cst_9 [2] : vector<1x8x8xf32> to vector<1x8xf32>
    %18 = vector.shape_cast %17 : vector<1x8xf32> to vector<1x8x1xf32>
    %19 = vector.broadcast %18 : vector<1x8x1xf32> to vector<1x8x8xf32>
    %20 = arith.subf %16, %19 : vector<1x8x8xf32>
    %21 = math.exp %20 : vector<1x8x8xf32>
    %cst_10 = arith.constant dense<0.000000e+00> : vector<1x8xf32>
    %22 = vector.multi_reduction <add>, %21, %cst_10 [2] : vector<1x8x8xf32> to vector<1x8xf32>
    %23 = vector.shape_cast %22 : vector<1x8xf32> to vector<1x8x1xf32>
    "tpu.trace_start"() <{level = 10 : i32, message = "bqk,bkd->bqd"}> : () -> ()
    %cst_11 = arith.constant dense<0.000000e+00> : vector<1x8x128xf32>
    %24 = tpu.matmul %21, %12, %cst_11 {dimension_numbers = #tpu.dot_dimension_numbers<[2], [1], [1], [2], [0, 0, 0, 1, 1, 2], [0], [0]>} : vector<1x8x8xf32>, vector<1x8x128xf32>, vector<1x8x128xf32> -> vector<1x8x128xf32>
    "tpu.trace_stop"() : () -> ()
    %25 = tpu.reciprocal %23 : vector<1x8x1xf32> -> vector<1x8x1xf32>
    %26 = vector.broadcast %25 : vector<1x8x1xf32> to vector<1x8x128xf32>
    %27 = arith.mulf %24, %26 : vector<1x8x128xf32>
    %c0_12 = arith.constant 0 : index
    %c0_13 = arith.constant 0 : index
    %c0_14 = arith.constant 0 : index
    %28 = vector.load %arg5[%c0_12, %c0_13, %c0_14] : memref<1x8x128xf32, #tpu.memory_space<vmem>>, vector<1x8x128xf32>
    tpu.vector_store %arg5[%c0_12, %c0_13, %c0_14], %27 {strides = array<i32>} : memref<1x8x128xf32, #tpu.memory_space<vmem>>, vector<1x8x128xf32>,
    return
  }
  func.func @transform_0(%arg0: i32) -> (i32, i32, i32) {
    %c0_i32 = arith.constant 0 : i32
    %c0_i32_0 = arith.constant 0 : i32
    %c0_i32_1 = arith.constant 0 : i32
    return %arg0, %c0_i32, %c0_i32_0 : i32, i32, i32
  }
  func.func @transform_1(%arg0: i32) -> (i32, i32) {
    %c0_i32 = arith.constant 0 : i32
    %c0_i32_0 = arith.constant 0 : i32
    %c0_i32_1 = arith.constant 0 : i32
    return %c0_i32, %c0_i32_0 : i32, i32
  }
  func.func @transform_2(%arg0: i32) -> (i32, i32) {
    %c0_i32 = arith.constant 0 : i32
    %c0_i32_0 = arith.constant 0 : i32
    %c0_i32_1 = arith.constant 0 : i32
    return %c0_i32, %c0_i32_0 : i32, i32
  }
  func.func @transform_3(%arg0: i32) -> (i32, i32) {
    %c0_i32 = arith.constant 0 : i32
    %c0_i32_0 = arith.constant 0 : i32
    %c0_i32_1 = arith.constant 0 : i32
    return %c0_i32, %c0_i32_0 : i32, i32
  }
  func.func @transform_4(%arg0: i32) -> (i32, i32, i32) {
    %c0_i32 = arith.constant 0 : i32
    %c0_i32_0 = arith.constant 0 : i32
    %c0_i32_1 = arith.constant 0 : i32
    return %arg0, %c0_i32, %c0_i32_0 : i32, i32, i32
  }
}

</mosaic_0001>

<bundles_post_ra>
// kernel: tpu_custom_call.1
= control target key start
LH: loop header
LB: loop body
LE: loop exit
PB: predicated region body
PF: predicated region fallthrough
CT: control target
= control target key end

     0   :  { %9 = vsyncpa [#allocation3], 0  ;;  %s1168_s0 = inlined_call_operand.hbm [shape: f32[2,8,32], index: 0, kind: input, shape index: {}]   ;;  %s1169_s1 = inlined_call_operand.hbm [shape: f32[32,384], index: 1, kind: input, shape index: {}]   ;;  %s1170_s2 = inlined_call_operand.vmem [shape: f32[1,384], index: 2, kind: input, shape index: {}]   ;;  %s1171_s3 = inlined_call_operand.hbm [shape: f32[8,8], index: 3, kind: input, shape index: {}]   ;;  %s1172_s4 = inlined_call_operand.hbm [shape: f32[2,8,128], index: 4, kind: output, shape index: {}]  }
   0x1   :  { %11 = vsyncpa [#allocation3 + $0x1], 0 }
   0x2   :  { %12 = vsyncpa [#allocation6], 0 }
   0x3   :  { %13 = vsyncpa [#allocation4], 0 }
   0x4   :  { %15 = vsyncpa [#allocation4 + $0x1], 0  ;;  %s982_s15 = smov 0   ;;  %s984_s16 = smov 0  }
   0x5   :  { %s986_s17 = smov 0   ;;  %s988_s18 = smov 0  }
   0x6 LB: > { %s1003_s19 = sadd.s32 4294967295, %s947_s18   ;;  %s675_s20 = sadd.s32 4294967294, %s947_s18   ;;  %s947_s18 = sphi %s988_s18, %s1194_s18   ;;  %s943_s17 = sphi %s986_s17, %s1193_s17   ;;  %s939_s16 = sphi %s984_s16, %s1192_s16   ;;  %s935_s15 = sphi %s982_s15, %s1191_s15  }
   0x7   : > { %p41_p0 = scmp.ne.s32.totalorder %s939_s16, %s935_s15  ;;  %p1173_p1 = scmp.eq.s32.totalorder %s1003_s19, 0 }
   0x8   : > { %p134_p3 = scmp.eq.s32.totalorder %s675_s20, 1  ;;  %p676_p5 = scmp.ge.s32.totalorder %s947_s18, 1 }
   0x9   : > { %p1012_p4 = por %p1173_p1, %p41_p0  ;;  %p141_p7 = scmp.lt.s32.totalorder %s947_s18, 3 }
   0xa   : > { %p1017_p6 = por %p134_p3, %p41_p0  ;;  %s949_s24 = smov [#allocation5]  }
   0xb   : > { %s1177_s21 = scalar_select %p1012_p4, 1, 0 }
   0xc   : > { %s1178_s22 = scalar_select %p1017_p6, 1, 0 }
   0xd   : > { %p1022_p8 = pnand %p676_p5, %p141_p7  ;;  %s153_s25 = sshll.u32 %s949_s24, 4  ;;  %s154_s25 = int_to_ptr.vmem [resolvable:$true] %s153_s25 }
   0xe   : > { %s950_s27 = smov [#allocation7]   ;;  %s810_s29 = scalar_lea.vmem %s154_s25, 1536 }
   0xf   : > { %s1179_s23 = scalar_select %p1022_p8, 1, 0 }
  0x10   : > { %p736_p9 = pneg %p1022_p8  ;;  %s170_s28 = sshll.u32 %s950_s27, 4  ;;  %s171_s28 = int_to_ptr.vmem [resolvable:$true] %s170_s28 }
  0x11   : > { %p811_p13 = scmp.ne.s32.totalorder %s154_s25, %s810_s29  ;;  %p818_p5 = scmp.lt.s32.totalorder %s154_s25, %s154_s25 }
  0x12   : > { %p1031_p11 = pnand %p736_p9, %p1173_p1  ;;  %p819_p7 = scmp.lt.s32.totalorder %s810_s29, %s810_s29 }
  0x14   : > { %p801_p12 = pneg %p1031_p11  ;;  %p820_p10 = por %p819_p7, %p818_p5 }
  0x16   : > { %p813_p0 = pnand %p811_p13, %p801_p12 }
  0x18   : > { %p814_p3 = pneg %p813_p0 }
  0x1a   : > { %p821_p9 = pnand %p820_p10, %p814_p3 }
  0x1c   : > { %824 = shalt.err (!%p821_p9)
}
  0x1d   : > { %s951_s30 = smov 384   ;;  %s952_s5 = smov 24  }
  0x1e   : > { %739 = dma.hbm_to_vmem [thread:$0]  (!%p1031_p11), %s1169_s1, 1536, %s154_s25, [#allocation6], %s951_s30, %s951_s30, %s952_s5  }
  0x1f   : > { %s836_s8 = scalar_lea.vmem %s171_s28, 128  ;;  %p844_p2 = scmp.lt.s32.totalorder %s171_s28, %s171_s28 }
  0x20   : > { %p837_p1 = scmp.ne.s32.totalorder %s171_s28, %s836_s8  ;;  %p845_p6 = scmp.lt.s32.totalorder %s836_s8, %s836_s8 }
  0x22   : > { %p839_p13 = pnand %p837_p1, %p801_p12  ;;  %p846_p5 = por %p845_p6, %p844_p2 }
  0x24   : > { %p840_p0 = pneg %p839_p13 }
  0x26   : > { %p847_p10 = pnand %p846_p5, %p840_p0 }
  0x28   : > { %850 = shalt.err (!%p847_p10)
}
  0x29   : > { %742 = dma.hbm_to_vmem [thread:$0]  (!%p1031_p11), %s1171_s3, 128, %s171_s28, [#allocation6]  }
  0x2a   : > { %s1054_s11 = sadd.s32 1, %s947_s18   ;;  %s28_s12 = sadd.s32 1, %s943_s17 }
  0x2b   : > { %s25_s13 = ssub.s32 %s947_s18, %s1054_s11  ;;  %p35_p1 = scmp.ne.s32.totalorder %s943_s17, %s939_s16 }
  0x2c   : > { %p26_p2 = scmp.eq.s32.totalorder %s25_s13, 0  ;;  %p36_p6 = scmp.eq.s32.totalorder %s947_s18, 0 }
  0x2d   : > { %p1181_p12 = scmp.eq.s32.totalorder %s1003_s19, 1  ;;  %p753_p7 = scmp.lt.s32.totalorder %s947_s18, 2 }
  0x2e   : > { %s1070_s20 = scalar_select %p26_p2, %s943_s17, %s28_s12  }
  0x2f   : > { %p1064_p3 = por %p1181_p12, %p35_p1  ;;  %p37_p9 = por %p36_p6, %p35_p1 }
  0x30   : > { %s181_s24 = sand.u32 1, %s943_s17   ;;  %s681_s26 = sshll.u32 %s947_s18, 7 }
  0x31   : > { %s1182_s14 = scalar_select %p1064_p3, 1, 0 }
  0x32   : > { %s680_s25 = sshll.u32 %s181_s24, 3  ;;  %s1077_s29 = scalar_lea.hbm %s1168_s0, %s681_s26 }
  0x33   : > { %s185_s30 = scalar_lea.vmem [#allocation2], %s680_s25  ;;  %p1079_p11 = pnand %p753_p7, %p37_p9 }
  0x34   : > { %s192_s5 = sshll.u32 %s185_s30, 4  ;;  %s182_s7 = scalar_lea.sflag [#allocation3], %s181_s24  ;;  %s193_s5 = int_to_ptr.vmem [resolvable:$true] %s192_s5 }
  0x35   : > { %s851_s8 = scalar_lea.hbm %s1077_s29, 128  ;;  %p853_p0 = pneg %p1079_p11 }
  0x36   : > { %p852_p13 = scmp.ne.s32.totalorder %s1077_s29, %s851_s8  ;;  %s856_s12 = scalar_lea.hbm %s1168_s0, 256 }
  0x37   : > { %p857_p1 = scmp.lt.s32.totalorder %s1077_s29, %s1168_s0  ;;  %p858_p2 = scmp.lt.s32.totalorder %s856_s12, %s851_s8 }
  0x38   : > { %p854_p5 = pnand %p853_p0, %p852_p13 }
  0x39   : > { %p859_p6 = por %p858_p2, %p857_p1 }
  0x3a   : > { %p855_p10 = pneg %p854_p5 }
  0x3c   : > { %p860_p12 = pnand %p859_p6, %p855_p10 }
  0x3e   : > { %863 = shalt.err (!%p860_p12)
}
  0x3f   : > { %s864_s26 = scalar_lea.vmem %s193_s5, 128  ;;  %s953_s24 = smov [#allocation2]  }
  0x40   : > { %p865_p7 = scmp.ne.s32.totalorder %s193_s5, %s864_s26  ;;  %s869_s27 = sshll.u32 %s953_s24, 4  ;;  %s870_s27 = int_to_ptr.vmem [resolvable:$false] %s869_s27 }
  0x41   : > { %s871_s28 = scalar_lea.vmem %s870_s27, 256  ;;  %p872_p13 = scmp.lt.s32.totalorder %s193_s5, %s870_s27 }
  0x42   : > { %p867_p9 = pnand %p865_p7, %p853_p0  ;;  %p873_p5 = scmp.lt.s32.totalorder %s871_s28, %s864_s26 }
  0x44   : > { %p868_p3 = pneg %p867_p9  ;;  %p874_p4 = por %p873_p5, %p872_p13 }
  0x46   : > { %p875_p8 = pnand %p874_p4, %p868_p3 }
  0x48   : > { %878 = shalt.err (!%p875_p8)
}
  0x49   : > { %746 = dma.hbm_to_vmem [thread:$0]  (!%p1079_p11), %s1077_s29, 128, %s193_s5, %s182_s7  }
  0x4a   : > { %p1184_p10 = scmp.ne.s32.totalorder %s1179_s23, 0 }
  0x4b   : > { %s1100_s30 = sand.u32 (!%p1184_p10), 1, %s939_s16   ;;  %p1185_p4 = scmp.ne.s32.totalorder (!%p1184_p10), %s1177_s21, 0 }
  0x4c   : > { %201 = sbr.rel (%p1184_p10) target bundleno = 855 (0x357), region = 36  ;;  %s683_s8 = sshll.u32 (!%p1184_p10), %s1100_s30, 3 }
  0x4d   : > { %s204_s9 = scalar_lea.sflag (!%p1184_p10), [#allocation3], %s1100_s30  ;;  %s207_s10 = scalar_lea.vmem (!%p1184_p10), [#allocation2], %s683_s8 }
  0x51   : > { %922 = dma.done.wait (%p1185_p4), %s204_s9, 128  }
  0x52   : > { %924 = vsyncadd (%p1185_p4), %s204_s9, 4294967168  ;;  %p1186_p8 = scmp.eq.s32.totalorder %s1003_s19, 0 }
  0x54   : > { %926 = dma.done.wait (%p1186_p8), [#allocation6], 1664   ;;  %p1187_p3 = pmov %p1186_p8 }
  0x55   : > { %v954_v0 = vmov 0.0   ;;  %v251_v1 = vld [vmem:[#allocation5 + $0x50] sm:$0xff]  ;;  %v250_v2 = vld [vmem:[#allocation5 + $0x48] sm:$0xff]  ;;  %v248_v3 = vld [vmem:[#allocation5 + $0x38] sm:$0xff]  ;;  %vm270_vm0 = vcmask 261120   ;;  %vm955_vm1 = vmmov 0   ;;  %v255_v14 = vlaneseq }
  0x56   : > { %928 = vsyncadd (%p1187_p3), [#allocation6], 4294965632  ;;  %338 = vmatprep.mubr.f32.mxu0 %v954_v0  ;;  %703 = vmatprep.subr.mxu1 %v954_v0  ;;  %v247_v4 = vld [vmem:[#allocation5 + $0x30] sm:$0xff]  ;;  %v245_v5 = vld [vmem:[#allocation5 + $0x20] sm:$0xff]  ;;  %vm486_vm2 = vcmask 64512   ;;  %s691_s29 = sshll.u32 %s1003_s19, 7 }
  0x57   : > { %298 = vmatprep.subr.mxu0 %v251_v1  ;;  %v244_v6 = vld [vmem:[#allocation5 + $0x18] sm:$0xff]  ;;  %v242_v7 = vld [vmem:[#allocation5 + $0x8] sm:$0xff]  ;;  %v241_v8 = vld [vmem:[#allocation5] sm:$0xff]  ;;  %711 = vmatprep.mubr.msk.f32.mxu1 %vm955_vm1, %v954_v0  ;;  %v256_v15 = vshrl.u32 %v255_v14, 7  ;;  %s239_s5 = scalar_lea.vmem [#allocation8], %s683_s8  ;;  %s1131_s13 = scalar_lea.hbm %s1172_s4, %s691_s29 }
  0x58   : > { %299 = vmatpush1.msra.mxu0 %v250_v2  ;;  %v240_v9 = vld [vmem:[%s207_s10] sm:$0xff]  ;;  %v249_v11 = vld [vmem:[#allocation5 + $0x40] sm:$0xff]  ;;  %v246_v12 = vld [vmem:[#allocation5 + $0x28] sm:$0xff]  ;;  %s586_s6 = sshll.u32 %s239_s5, 4  ;;  %s573_s25 = scalar_lea.sflag [#allocation4], %s1100_s30  ;;  %s587_s6 = int_to_ptr.vmem [resolvable:$true] %s586_s6 }
  0x59   : > { %300 = vmatprep.subr.mxu0 %v248_v3  ;;  %v252_v10 = vld [vmem:[#allocation5 + $0x58] sm:$0xff]  ;;  %v243_v13 = vld [vmem:[#allocation5 + $0x10] sm:$0xff]  ;;  %v261_v16 = vsub.s32 1, %v256_v15  ;;  %v257_v18 = vsub.s32 0, %v256_v15  ;;  %v415_v25 = vld [vmem:[#allocation7] sm:$0xff]  ;;  %v265_v30 = vsub.s32 2, %v256_v15 }
  0x5a   : > { %301 = vmatpush1.msra.mxu0 %v247_v4  ;;  %704 = vmatpush3.msra.mxu1 %v252_v10  ;;  %v253_v17 = vld [vmem:[%s1170_s2] sm:$0x7]  ;;  %s879_s26 = scalar_lea.vmem %s587_s6, 128  ;;  %p1188_p0 = scmp.ne.s32.totalorder %s1182_s14, 0 }
  0x5b   : > { %302 = vmatprep.subr.mxu0 %v245_v5  ;;  %705 = vmatprep.subr.mxu1 %v954_v0  ;;  %v262_v19 = vrot.slane %v253_v17, %v261_v16  ;;  %v258_v21 = vrot.slane %v253_v17, %v257_v18  ;;  %v266_v32 = vrot.slane %v253_v17, %v265_v30  ;;  %p880_p11 = scmp.ne.s32.totalorder %s587_s6, %s879_s26  ;;  %s956_s19 = smov [#allocation8]  }
  0x5c   : > { %303 = vmatpush1.msra.mxu0 %v244_v6  ;;  %706 = vmatpush3.msra.mxu1 %v249_v11  ;;  %s883_s24 = sshll.u32 %s956_s19, 4  ;;  %s884_s24 = int_to_ptr.vmem [resolvable:$false] %s883_s24 }
  0x5d   : > { %304 = vmatprep.subr.mxu0 %v242_v7  ;;  %707 = vmatprep.subr.mxu1 %v954_v0  ;;  %p881_p1 = pnand %p880_p11, %p1188_p0  ;;  %s885_s27 = scalar_lea.vmem %s884_s24, 256 }
  0x5e   : > { %305 = vmatpush1.msra.mxu0 %v241_v8  ;;  %708 = vmatpush3.msra.mxu1 %v246_v12  ;;  %p886_p6 = scmp.lt.s32.totalorder %s587_s6, %s884_s24  ;;  %p887_p12 = scmp.lt.s32.totalorder %s885_s27, %s879_s26 }
  0x5f   : > { %687 = vmatmul.mubr.msk.f32.vlgmr.msra.gmra.mxu0 %vm270_vm0, %v240_v9  ;;  %714 = vmatprep.subr.mxu0 %v954_v0  ;;  %p882_p2 = pneg %p881_p1 }
  0x60   : > { %716 = vmatprep.mubr.msk.f32.mxu0 %vm955_vm1, %v954_v0  ;;  %709 = vmatprep.subr.mxu1 %v954_v0  ;;  %p888_p7 = por %p887_p12, %p886_p6 }
  0x61   : > { %710 = vmatpush3.msra.mxu1 %v243_v13 }
  0x62   : > { %712 = vmatmul.mubr.msk.f32.vlgmr.msra.gmra.mxu1 %vm270_vm0, %v240_v9  ;;  %719 = vmatprep.subr.mxu1 %v954_v0  ;;  %p889_p9 = pnand %p888_p7, %p882_p2 }
  0x63   : > { %721 = vmatprep.mubr.msk.f32.mxu1 %vm955_vm1, %v954_v0 }
 0x11f   : > { %v340_v20 = vpop.f32.mrf.mxu0 }
 0x120   : > { %v341_v24 = vadd.f32 %v340_v20, %v258_v21 }
 0x121   : > { %v342_v22 = vpop.f32.mrf.mxu0 }
 0x122   : > { %v343_v23 = vadd.f32 %v342_v22, %v262_v19  ;;  %v411_v31 = vpop.f32.mrf.mxu1 }
 0x123   : > { %v412_v34 = vadd.f32 %v411_v31, %v266_v32 }
 0x124   : > { %715 = vmatpush3.xpose.msra.mxu0 %v343_v23  ;;  %v713_v33 = vpop.f32.mrf.mxu1 }
 0x125   : > { %720 = vmatpush3.msra.mxu1 %v412_v34 }
 0x127   : > { %717 = vmatmul.mubr.f32.vlgmr.msra.gmra.mxu0 %v341_v24 }
 0x1e7   : > { %v482_v26 = vpop.f32.mrf.mxu0 }
 0x1e8   : > { %v483_v27 = vadd.f32 %v482_v26, %v415_v25 }
 0x1e9   : > { %v718_v28 = vpop.f32.mrf.mxu0 }
 0x1ea   : > { %v487_v29 = vsel %vm486_vm2, %v483_v27, -inf }
 0x1eb   : > { %488 = vmax.xlane.f32.xlu0 %v487_v29 }
 0x274   : > { %v489_v35 = vpop.xlane.xlu0 %488 }
 0x275   : > { %v490_v36 = vsub.f32 %v483_v27, %v489_v35 }
 0x277   : > { %v491_v37 = vmul.f32 1.442695, %v490_v36 }
 0x279   : > { %795 = vpow2.f32 %v491_v37 }
 0x286   : > { %v796_v38 = vpop.eup %795 }
 0x287   : > { %722 = vmatmul.mubr.msk.f32.vlgmr.msra.gmra.mxu1 %vm486_vm2, %v796_v38  ;;  %v493_v39 = vsel %vm486_vm2, %v796_v38, 0.0 }
 0x288   : > { %494 = vadd.xlane.f32.xlu0 %v493_v39 }
 0x311   : > { %v495_v40 = vpop.xlane.xlu0 %494 }
 0x312   : > { %797 = vrcp.f32 %v495_v40 }
 0x31f   : > { %v798_v41 = vpop.eup %797 }
 0x347   : > { %v565_v42 = vpop.f32.mrf.mxu1 }
 0x348   : > { %v570_v43 = vmul.f32 %v798_v41, %v565_v42 }
 0x349   : > { %v723_v44 = vpop.f32.mrf.mxu1 }
 0x34a   : > { %571 = vst [vmem:[%s239_s5] sm:$0xff] %v570_v43 }
 0x34b   : > { %892 = shalt.err (!%p889_p9)
}
 0x34c   : > { %s893_s28 = scalar_lea.hbm %s1131_s13, 128  ;;  %s897_s9 = scalar_lea.hbm %s1172_s4, 256 }
 0x34d   : > { %p894_p13 = scmp.ne.s32.totalorder %s1131_s13, %s893_s28  ;;  %p898_p4 = scmp.lt.s32.totalorder %s1131_s13, %s1172_s4 }
 0x34e   : > { %p899_p8 = scmp.lt.s32.totalorder %s897_s9, %s893_s28 }
 0x34f   : > { %p895_p5 = pnand %p894_p13, %p1188_p0 }
 0x350   : > { %p900_p3 = por %p899_p8, %p898_p4 }
 0x351   : > { %p896_p10 = pneg %p895_p5 }
 0x353   : > { %p901_p11 = pnand %p900_p3, %p896_p10 }
 0x355   : > { %904 = shalt.err (!%p901_p11)
}
 0x356   : > { %734 = dma.vmem_to_hbm [thread:$0]  (%p1188_p0), %s587_s6, 128, %s1131_s13, %s573_s25  }
 0x357 PF: > { %s598_s23 = sand.u32 1, %s935_s15   ;;  %p1189_p1 = scmp.ne.s32.totalorder %s1178_s22, 0 }
 0x358   : > { %p1190_p2 = scmp.ge.s32.totalorder %s947_s18, 2  ;;  %s599_s29 = scalar_lea.sflag [#allocation4], %s598_s23 }
 0x35a   : > { %p748_p6 = pnand %p1190_p2, %p1189_p1 }
 0x35c   : > { %p749_p12 = pneg %p748_p6 }
 0x35e   : > { %930 = dma.done.wait (%p749_p12), %s599_s29, 128  }
 0x35f   : > { %932 = vsyncadd (%p749_p12), %s599_s29, 4294967168  ;;  %p18_p7 = scmp.ge.s32.totalorder %s1054_s11, 4   ;;  %s1191_s15 = smov %s939_s16 }
 0x360   : > { %s1192_s16 = smov %s943_s17  ;;  %s1193_s17 = smov %s1070_s20 }
 0x361   : > { %s1194_s18 = smov %s1054_s11  ;;  %20 = sbr.rel (!%p18_p7) target bundleno = 6 (0x6), region = 89 }
 0x366   :  { %604 = vsyncpa [#allocation3], 1 }
 0x367   :  { %606 = vsyncpa [#allocation3 + $0x1], 1 }
 0x368   :  { %607 = vsyncpa [#allocation6], 1 }
 0x369   :  { %608 = vsyncpa [#allocation4], 1 }
 0x36a   :  { %610 = vsyncpa [#allocation4 + $0x1], 1 }

</bundles_post_ra>
